<compile_context>
chip_gen: v7x
topology: tpu7x:2x2x1
jax: 0.10.0
libtpu: 0.0.40
codegen_flags: <defaults>
</compile_context>

<pallas_src>
import jax
import jax.numpy as jnp
from jax.experimental import pallas as pl
from jax.experimental.pallas import tpu as pltpu


# ----------------------------- Pallas kernels ------------------------------

def _embed_messages_kernel(x_ref, e_ref, w_ref, h_ref, m_ref):
    """Per source-node tile s:  h[s] = x[s] @ E ;  M1[r, s] = h[s] @ W1_r."""
    h32 = jnp.dot(x_ref[...], e_ref[...], preferred_element_type=jnp.float32)
    hb = h32.astype(jnp.bfloat16)
    h_ref[...] = hb
    n_rel = w_ref.shape[0]
    for r in range(n_rel):                       # static unroll (R is small)
        m_ref[r, :, :] = jnp.dot(
            hb, w_ref[r, :, :],
            preferred_element_type=jnp.float32).astype(m_ref.dtype)


def _aggregate_kernel(h_ref, root_ref, a_ref, m_ref, out_ref, acc_ref):
    """out[i] = h[i] @ root + sum_k A_flat[i, k-block] @ M_flat[k-block]."""
    k = pl.program_id(1)

    @pl.when(k == 0)
    def _():
        acc_ref[...] = jnp.dot(h_ref[...], root_ref[...],
                               preferred_element_type=jnp.float32)

    acc_ref[...] += jnp.dot(a_ref[...], m_ref[...],
                            preferred_element_type=jnp.float32)

    @pl.when(k == pl.num_programs(1) - 1)
    def _():
        out_ref[...] = acc_ref[...].astype(out_ref.dtype)


def _aggregate_messages_kernel(h_ref, root_ref, a_ref, m_ref, wn_ref,
                               out_ref, mn_ref, acc_ref):
    """Layer-l aggregation fused with the layer-(l+1) message precompute."""
    k = pl.program_id(1)

    @pl.when(k == 0)
    def _():
        acc_ref[...] = jnp.dot(h_ref[...], root_ref[...],
                               preferred_element_type=jnp.float32)

    acc_ref[...] += jnp.dot(a_ref[...], m_ref[...],
                            preferred_element_type=jnp.float32)

    @pl.when(k == pl.num_programs(1) - 1)
    def _():
        out_ref[...] = acc_ref[...].astype(out_ref.dtype)
        hb = acc_ref[...].astype(jnp.bfloat16)
        n_rel = wn_ref.shape[0]
        for r in range(n_rel):                   # static unroll
            mn_ref[r, :, :] = jnp.dot(
                hb, wn_ref[r, :, :],
                preferred_element_type=jnp.float32).astype(mn_ref.dtype)


# ------------------------------ wrappers -----------------------------------

def pallas_embed_and_messages(x, embed, w, *, tile):
    """K1: h = x @ embed  and  M1[r, s] = h[s] @ W_r  (both bf16 outputs)."""
    n_pad, feat = x.shape
    d_in = embed.shape[1]
    n_rel, _, d_out = w.shape
    nt = n_pad // tile
    return pl.pallas_call(
        _embed_messages_kernel,
        out_shape=(jax.ShapeDtypeStruct((n_pad, d_in), jnp.bfloat16),
                   jax.ShapeDtypeStruct((n_rel, n_pad, d_out), jnp.bfloat16)),
        grid_spec=pltpu.PrefetchScalarGridSpec(
            num_scalar_prefetch=0,
            grid=(nt,),
            in_specs=[
                pl.BlockSpec((tile, feat), lambda s: (s, 0)),
                pl.BlockSpec((feat, d_in), lambda s: (0, 0)),
                pl.BlockSpec((n_rel, d_in, d_out), lambda s: (0, 0, 0)),
            ],
            out_specs=[
                pl.BlockSpec((tile, d_in), lambda s: (s, 0)),
                pl.BlockSpec((n_rel, tile, d_out), lambda s: (0, s, 0)),
            ],
        ),
        compiler_params=pltpu.CompilerParams(
            dimension_semantics=("parallel",)),
    )(x, embed, w)


def pallas_rgcn_aggregate(h, root, a_flat, m_flat, *, tile, tk,
                          w_next=None, out_dtype=jnp.float32):
    """out[i] = h[i] @ root + A_flat[i, :] @ M_flat.

    h      : [N_pad, din]        bf16
    root   : [din, dout]         bf16
    a_flat : [N_pad, R*N_pad]    bf16  (a_flat[dst, r*N_pad + src] = #edges)
    m_flat : [R*N_pad, dout]     bf16  (m_flat[r*N_pad + src] = h[src] @ W_r)
    w_next : optional [R, dout, dnext] bf16 — if given, also emits the next
             layer's messages M_next[r, dst] = out[dst] @ W_next_r (bf16).
    """
    n_pad, d_in = h.shape
    d_out = root.shape[1]
    nt = n_pad // tile
    kt = a_flat.shape[1] // tk

    in_specs = [
        pl.BlockSpec((tile, d_in), lambda i, k: (i, 0)),     # h (root term)
        pl.BlockSpec((d_in, d_out), lambda i, k: (0, 0)),    # root weight
        pl.BlockSpec((tile, tk), lambda i, k: (i, k)),       # adjacency slab
        pl.BlockSpec((tk, d_out), lambda i, k: (k, 0)),      # messages slab
    ]
    out_spec_main = pl.BlockSpec((tile, d_out), lambda i, k: (i, 0))
    scratch = [pltpu.VMEM((tile, d_out), jnp.float32)]
    cparams = pltpu.CompilerParams(
        dimension_semantics=("parallel", "arbitrary"),
        vmem_limit_bytes=32 * 1024 * 1024)

    if w_next is None:
        return pl.pallas_call(
            _aggregate_kernel,
            out_shape=jax.ShapeDtypeStruct((n_pad, d_out), out_dtype),
            grid_spec=pltpu.PrefetchScalarGridSpec(
                num_scalar_prefetch=0,
                grid=(nt, kt),
                in_specs=in_specs,
                out_specs=out_spec_main,
                scratch_shapes=scratch),
            compiler_params=cparams,
        )(h, root, a_flat, m_flat)

    n_rel, _, d_next = w_next.shape
    return pl.pallas_call(
        _aggregate_messages_kernel,
        out_shape=(jax.ShapeDtypeStruct((n_pad, d_out), out_dtype),
                   jax.ShapeDtypeStruct((n_rel, n_pad, d_next), jnp.bfloat16)),
        grid_spec=pltpu.PrefetchScalarGridSpec(
            num_scalar_prefetch=0,
            grid=(nt, kt),
            in_specs=in_specs + [
                pl.BlockSpec((n_rel, d_out, d_next), lambda i, k: (0, 0, 0)),
            ],
            out_specs=[
                out_spec_main,
                pl.BlockSpec((n_rel, tile, d_next), lambda i, k: (0, i, 0)),
            ],
            scratch_shapes=scratch),
        compiler_params=cparams,
    )(h, root, a_flat, m_flat, w_next)


# ------------------------------ JAX glue ----------------------------------

def _round_up(v, m):
    return ((v + m - 1) // m) * m


def _pick_dst_tile(n_pad):
    # Prefer >= 2 destination tiles so the "parallel" axis feeds both v7x TCs.
    for t in (256, 128, 64):
        if n_pad % t == 0 and n_pad // t >= 2:
            return t
    return n_pad


def _pick_k_tile(total, target=512):
    # Largest multiple of 128 that divides `total` and is <= target.
    best, t = 128, 128
    while t <= min(total, target):
        if total % t == 0:
            best = t
        t += 128
    return best


def build_relation_adjacency_flat(edge_index, edge_et, n_relations, n_pad):
    """A_flat[dst, r*N_pad + src] = #edges (src -> dst) of relation r.

    Matches the reference's per-relation edge slicing + scatter_add.  Built in
    f32 then cast to bf16 (exact for counts <= 256).
    """
    src = edge_index[0]
    dst = edge_index[1]
    a = jnp.zeros((n_pad, n_relations * n_pad), jnp.float32)
    a = a.at[dst, edge_et * n_pad + src].add(1.0)
    return a.astype(jnp.bfloat16)


def _combine_basis(p):
    # W_r = (att @ basis.reshape(B, -1)).reshape(R, din, dout) — tiny f32 glue.
    n_rel, n_bases = p["att"].shape
    din, dout = p["root"].shape
    w = jnp.matmul(p["att"], p["basis"].reshape(n_bases, din * dout))
    return w.reshape(n_rel, din, dout)


def init_params(key, feat_dim, r1_in, r1_out, r2_out, n_relations, n_bases):
    ks = jax.random.split(key, 7)
    params = {
        # self.embedding.data.normal_()  (std 1)
        "embed": jax.random.normal(ks[0], (feat_dim, r1_in), jnp.float32),
        # rgcn1: after_relu=False -> std 1/sqrt(in_dim); att std 1/sqrt(n_bases)
        "rgcn1": {
            "basis": jax.random.normal(ks[1], (n_bases, r1_in, r1_out)) / jnp.sqrt(r1_in),
            "att": jax.random.normal(ks[2], (n_relations, n_bases)) / jnp.sqrt(n_bases),
            "root": jax.random.normal(ks[3], (r1_in, r1_out)) / jnp.sqrt(r1_in),
        },
        # rgcn2: after_relu=True -> std 2/in_dim
        "rgcn2": {
            "basis": jax.random.normal(ks[4], (n_bases, r1_out, r2_out)) * (2.0 / r1_out),
            "att": jax.random.normal(ks[5], (n_relations, n_bases)) / jnp.sqrt(n_bases),
            "root": jax.random.normal(ks[6], (r1_out, r2_out)) * (2.0 / r1_out),
        },
    }
    return jax.tree_util.tree_map(lambda a: a.astype(jnp.float32), params)


def rgcn_forward(params, x, edge_index, edge_et, edge_range, n_relations):
    # edge_range is implied by edge_et (edges sorted by relation); the dense
    # per-relation adjacency covers the same slicing.
    del edge_range
    n_nodes, feat_dim = x.shape
    n_pad = _round_up(max(n_nodes, 128), 128)
    tile = _pick_dst_tile(n_pad)
    tk = _pick_k_tile(n_relations * n_pad)

    a_flat = build_relation_adjacency_flat(edge_index, edge_et, n_relations, n_pad)

    # NOTE: input features are cast to bf16 (small extra precision loss vs the
    # f32 reference — covered by the test tolerance).
    x_pad = jnp.zeros((n_pad, feat_dim), jnp.bfloat16)
    x_pad = x_pad.at[:n_nodes].set(x.astype(jnp.bfloat16))

    w1 = _combine_basis(params["rgcn1"]).astype(jnp.bfloat16)   # [R, d1in, d1out]
    w2 = _combine_basis(params["rgcn2"]).astype(jnp.bfloat16)   # [R, d1out, d2out]
    root1 = params["rgcn1"]["root"].astype(jnp.bfloat16)
    root2 = params["rgcn2"]["root"].astype(jnp.bfloat16)
    embed = params["embed"].astype(jnp.bfloat16)

    # K1: h = x @ embedding  +  layer-1 per-relation messages.
    h, m1 = pallas_embed_and_messages(x_pad, embed, w1, tile=tile)
    m1_flat = m1.reshape(n_relations * n_pad, -1)      # free (contiguous) view

    # K2: layer-1 aggregation (root + A_flat @ M1), fused with layer-2
    #     message precompute; intermediates stay bf16.
    out1, m2 = pallas_rgcn_aggregate(h, root1, a_flat, m1_flat,
                                     tile=tile, tk=tk,
                                     w_next=w2, out_dtype=jnp.bfloat16)
    m2_flat = m2.reshape(n_relations * n_pad, -1)

    # K3: layer-2 aggregation, final f32 output.
    out2 = pallas_rgcn_aggregate(out1, root2, a_flat, m2_flat,
                                 tile=tile, tk=tk,
                                 w_next=None, out_dtype=jnp.float32)
    return out2[:n_nodes]


# --------------------------- pure-JAX reference ----------------------------

def _ref_layer(h, p, edge_index, edge_et):
    n_rel, n_bases = p["att"].shape
    din, dout = p["root"].shape
    w = jnp.matmul(p["att"], p["basis"].reshape(n_bases, -1)).reshape(n_rel, din, dout)
    out = h @ p["root"]
    msgs = jnp.einsum("ed,edo->eo", h[edge_index[0]], w[edge_et])
    return out.at[edge_index[1]].add(msgs)


def rgcn_forward_ref(params, x, edge_index, edge_et):
    h = x @ params["embed"]
    h = _ref_layer(h, params["rgcn1"], edge_index, edge_et)
    h = _ref_layer(h, params["rgcn2"], edge_index, edge_et)
    return h


# --------------------------------- main ------------------------------------

if __name__ == "__main__":
    n_nodes, feat_dim = 64, 16
    r1_in, r1_out, r2_out = 32, 32, 16
    n_relations, n_bases = 3, 2
    n_edges = 48

    key = jax.random.PRNGKey(0)
    k_par, k_x, k_src, k_dst, k_rel = jax.random.split(key, 5)

    params = init_params(k_par, feat_dim, r1_in, r1_out, r2_out,
                         n_relations, n_bases)

    x = jax.random.normal(k_x, (n_nodes, feat_dim), jnp.float32)
    src = jax.random.randint(k_src, (n_edges,), 0, n_nodes, jnp.int32)
    dst = jax.random.randint(k_dst, (n_edges,), 0, n_nodes, jnp.int32)
    edge_et = jnp.sort(jax.random.randint(k_rel, (n_edges,), 0, n_relations,
                                          jnp.int32))
    edge_index = jnp.stack([src, dst], axis=0)
    counts = jnp.array([jnp.sum(edge_et == r) for r in range(n_relations)],
                       jnp.int32)
    ends = jnp.cumsum(counts)
    starts = ends - counts
    edge_range = jnp.stack([starts, ends], axis=1)  # (n_relations, 2)

    out = rgcn_forward(params, x, edge_index, edge_et, edge_range, n_relations)
    out = jax.block_until_ready(out)

    ref = rgcn_forward_ref(params, x, edge_index, edge_et)
    assert out.shape == (n_nodes, r2_out)

    # Kernel runs in bf16 (f32 accumulation); compare against the f32 reference
    # with a scale-relative tolerance.
    err = jnp.max(jnp.abs(out - ref))
    scale = jnp.max(jnp.abs(ref))
    assert err <= 5e-2 * scale + 1e-1, f"mismatch vs reference: err={err}, scale={scale}"

    print("KERNEL_OK")
</pallas_src>

<mosaic_0001>
module attributes {stable_mosaic.version = 11 : i64} {
  func.func @_embed_messages_kernel(%arg0: i32, %arg1: memref<64x16xbf16, #tpu.memory_space<vmem>>, %arg2: memref<16x32xbf16, #tpu.memory_space<vmem>>, %arg3: memref<3x32x32xbf16, #tpu.memory_space<vmem>>, %arg4: memref<64x32xbf16, #tpu.memory_space<vmem>>, %arg5: memref<3x64x32xbf16, #tpu.memory_space<vmem>>) attributes {dimension_semantics = [#tpu.dimension_semantics<parallel>], iteration_bounds = array<i64: 2>, scalar_prefetch = 0 : i64, scratch_operands = 0 : i64, tpu.core_type = #tpu.core_type<tc>, window_params = [{transform_indices = @transform_0, window_bounds = array<i64: 64, 16>}, {pipeline_mode = #tpu.pipeline_mode<synchronous>, transform_indices = @transform_1, window_bounds = array<i64: 16, 32>}, {pipeline_mode = #tpu.pipeline_mode<synchronous>, transform_indices = @transform_2, window_bounds = array<i64: 3, 32, 32>}, {transform_indices = @transform_3, window_bounds = array<i64: 64, 32>}, {transform_indices = @transform_4, window_bounds = array<i64: 3, 64, 32>}]} {
    %c0 = arith.constant 0 : index
    %c0_0 = arith.constant 0 : index
    %0 = vector.load %arg1[%c0, %c0_0] : memref<64x16xbf16, #tpu.memory_space<vmem>>, vector<64x16xbf16>
    %c0_1 = arith.constant 0 : index
    %c0_2 = arith.constant 0 : index
    %1 = vector.load %arg2[%c0_1, %c0_2] : memref<16x32xbf16, #tpu.memory_space<vmem>>, vector<16x32xbf16>
    %cst = arith.constant dense<0.000000e+00> : vector<64x32xf32>
    %2 = tpu.matmul %0, %1, %cst {dimension_numbers = #tpu.dot_dimension_numbers<[1], [0], [0], [1], [0, 0, 1, 1], [], []>} : vector<64x16xbf16>, vector<16x32xbf16>, vector<64x32xf32> -> vector<64x32xf32>
    %3 = arith.truncf %2 : vector<64x32xf32> to vector<64x32xbf16>
    %c0_3 = arith.constant 0 : index
    %c0_4 = arith.constant 0 : index
    %4 = vector.load %arg4[%c0_3, %c0_4] : memref<64x32xbf16, #tpu.memory_space<vmem>>, vector<64x32xbf16>
    tpu.vector_store %arg4[%c0_3, %c0_4], %3 {strides = array<i32>} : memref<64x32xbf16, #tpu.memory_space<vmem>>, vector<64x32xbf16>,
    %c0_5 = arith.constant 0 : index
    %c0_6 = arith.constant 0 : index
    %c0_7 = arith.constant 0 : index
    %5 = vector.load %arg3[%c0_5, %c0_6, %c0_7] : memref<3x32x32xbf16, #tpu.memory_space<vmem>>, vector<1x32x32xbf16>
    %6 = vector.shape_cast %5 : vector<1x32x32xbf16> to vector<32x32xbf16>
    %cst_8 = arith.constant dense<0.000000e+00> : vector<64x32xf32>
    %7 = tpu.matmul %3, %6, %cst_8 {dimension_numbers = #tpu.dot_dimension_numbers<[1], [0], [0], [1], [0, 0, 1, 1], [], []>} : vector<64x32xbf16>, vector<32x32xbf16>, vector<64x32xf32> -> vector<64x32xf32>
    %8 = arith.truncf %7 : vector<64x32xf32> to vector<64x32xbf16>
    %c0_9 = arith.constant 0 : index
    %c0_10 = arith.constant 0 : index
    %c0_11 = arith.constant 0 : index
    %9 = vector.load %arg5[%c0_9, %c0_10, %c0_11] : memref<3x64x32xbf16, #tpu.memory_space<vmem>>, vector<1x64x32xbf16>
    %10 = vector.shape_cast %9 : vector<1x64x32xbf16> to vector<64x32xbf16>
    %11 = vector.shape_cast %8 : vector<64x32xbf16> to vector<1x64x32xbf16>
    tpu.vector_store %arg5[%c0_9, %c0_10, %c0_11], %11 {strides = array<i32>} : memref<3x64x32xbf16, #tpu.memory_space<vmem>>, vector<1x64x32xbf16>,
    %c1 = arith.constant 1 : index
    %c0_12 = arith.constant 0 : index
    %c0_13 = arith.constant 0 : index
    %12 = vector.load %arg3[%c1, %c0_12, %c0_13] : memref<3x32x32xbf16, #tpu.memory_space<vmem>>, vector<1x32x32xbf16>
    %13 = vector.shape_cast %12 : vector<1x32x32xbf16> to vector<32x32xbf16>
    %cst_14 = arith.constant dense<0.000000e+00> : vector<64x32xf32>
    %14 = tpu.matmul %3, %13, %cst_14 {dimension_numbers = #tpu.dot_dimension_numbers<[1], [0], [0], [1], [0, 0, 1, 1], [], []>} : vector<64x32xbf16>, vector<32x32xbf16>, vector<64x32xf32> -> vector<64x32xf32>
    %15 = arith.truncf %14 : vector<64x32xf32> to vector<64x32xbf16>
    %c1_15 = arith.constant 1 : index
    %c0_16 = arith.constant 0 : index
    %c0_17 = arith.constant 0 : index
    %16 = vector.load %arg5[%c1_15, %c0_16, %c0_17] : memref<3x64x32xbf16, #tpu.memory_space<vmem>>, vector<1x64x32xbf16>
    %17 = vector.shape_cast %16 : vector<1x64x32xbf16> to vector<64x32xbf16>
    %18 = vector.shape_cast %15 : vector<64x32xbf16> to vector<1x64x32xbf16>
    tpu.vector_store %arg5[%c1_15, %c0_16, %c0_17], %18 {strides = array<i32>} : memref<3x64x32xbf16, #tpu.memory_space<vmem>>, vector<1x64x32xbf16>,
    %c2 = arith.constant 2 : index
    %c0_18 = arith.constant 0 : index
    %c0_19 = arith.constant 0 : index
    %19 = vector.load %arg3[%c2, %c0_18, %c0_19] : memref<3x32x32xbf16, #tpu.memory_space<vmem>>, vector<1x32x32xbf16>
    %20 = vector.shape_cast %19 : vector<1x32x32xbf16> to vector<32x32xbf16>
    %cst_20 = arith.constant dense<0.000000e+00> : vector<64x32xf32>
    %21 = tpu.matmul %3, %20, %cst_20 {dimension_numbers = #tpu.dot_dimension_numbers<[1], [0], [0], [1], [0, 0, 1, 1], [], []>} : vector<64x32xbf16>, vector<32x32xbf16>, vector<64x32xf32> -> vector<64x32xf32>
    %22 = arith.truncf %21 : vector<64x32xf32> to vector<64x32xbf16>
    %c2_21 = arith.constant 2 : index
    %c0_22 = arith.constant 0 : index
    %c0_23 = arith.constant 0 : index
    %23 = vector.load %arg5[%c2_21, %c0_22, %c0_23] : memref<3x64x32xbf16, #tpu.memory_space<vmem>>, vector<1x64x32xbf16>
    %24 = vector.shape_cast %23 : vector<1x64x32xbf16> to vector<64x32xbf16>
    %25 = vector.shape_cast %22 : vector<64x32xbf16> to vector<1x64x32xbf16>
    tpu.vector_store %arg5[%c2_21, %c0_22, %c0_23], %25 {strides = array<i32>} : memref<3x64x32xbf16, #tpu.memory_space<vmem>>, vector<1x64x32xbf16>,
    return
  }
  func.func @transform_0(%arg0: i32) -> (i32, i32) {
    %c0_i32 = arith.constant 0 : i32
    %c0_i32_0 = arith.constant 0 : i32
    return %arg0, %c0_i32 : i32, i32
  }
  func.func @transform_1(%arg0: i32) -> (i32, i32) {
    %c0_i32 = arith.constant 0 : i32
    %c0_i32_0 = arith.constant 0 : i32
    %c0_i32_1 = arith.constant 0 : i32
    return %c0_i32, %c0_i32_0 : i32, i32
  }
  func.func @transform_2(%arg0: i32) -> (i32, i32, i32) {
    %c0_i32 = arith.constant 0 : i32
    %c0_i32_0 = arith.constant 0 : i32
    %c0_i32_1 = arith.constant 0 : i32
    %c0_i32_2 = arith.constant 0 : i32
    return %c0_i32, %c0_i32_0, %c0_i32_1 : i32, i32, i32
  }
  func.func @transform_3(%arg0: i32) -> (i32, i32) {
    %c0_i32 = arith.constant 0 : i32
    %c0_i32_0 = arith.constant 0 : i32
    return %arg0, %c0_i32 : i32, i32
  }
  func.func @transform_4(%arg0: i32) -> (i32, i32, i32) {
    %c0_i32 = arith.constant 0 : i32
    %c0_i32_0 = arith.constant 0 : i32
    %c0_i32_1 = arith.constant 0 : i32
    return %c0_i32, %arg0, %c0_i32_0 : i32, i32, i32
  }
}

</mosaic_0001>

<bundles_post_ra>
// kernel: tpu_custom_call.1
= control target key start
LH: loop header
LB: loop body
LE: loop exit
PB: predicated region body
PF: predicated region fallthrough
CT: control target
= control target key end

     0   :  { %s1253_s15 = smov 0   ;;  %s1255_s16 = smov 0   ;;  %s1419_s0 = inlined_call_operand.vmem [shape: bf16[128,16], index: 0, kind: input, shape index: {}]   ;;  %s1420_s1 = inlined_call_operand.vmem [shape: bf16[16,32], index: 1, kind: input, shape index: {}]   ;;  %s1421_s2 = inlined_call_operand.vmem [shape: bf16[3,32,32], index: 2, kind: input, shape index: {}]   ;;  %s1422_s3 = inlined_call_operand.vmem [shape: bf16[128,32], index: 3, kind: output, shape index: {0}]   ;;  %s1423_s4 = inlined_call_operand.vmem [shape: bf16[3,128,32], index: 4, kind: output, shape index: {1}]  }
   0x1   :  { %s1257_s17 = smov 0  }
   0x2 LB: > { %s1266_s18 = sadd.s32 4294967295, %s1226_s17   ;;  %s1268_s19 = sadd.s32 1, %s1226_s17   ;;  %s1226_s17 = sphi %s1257_s17, %s1427_s17   ;;  %s1222_s16 = sphi %s1255_s16, %s1426_s16   ;;  %s1218_s15 = sphi %s1253_s15, %s1425_s15  }
   0x3   : > { %s113_s20 = ssub.s32 %s1226_s17, %s1268_s19  ;;  %s116_s21 = sadd.s32 1, %s1222_s16 }
   0x4   : > { %p114_p0 = scmp.eq.s32.totalorder %s113_s20, 0  ;;  %p126_p1 = scmp.ne.s32.totalorder %s1222_s16, %s1218_s15 }
   0x5   : > { %p127_p2 = scmp.eq.s32.totalorder %s1266_s18, 1  ;;  %p974_p3 = scmp.ge.s32.totalorder %s1226_s17, 1 }
   0x6   : > { %s1276_s22 = scalar_select %p114_p0, %s1222_s16, %s116_s21  }
   0x7   : > { %p1278_p4 = por %p127_p2, %p126_p1  ;;  %p166_p5 = scmp.lt.s32.totalorder %s1226_s17, 3 }
   0x9   : > { %p167_p6 = pnand %p974_p3, %p166_p5 }
   0xa   : > { %v1193_v0 = vld [vmem:[%s1420_s1] sm:$0xff] (!%p167_p6)   ;;  %s975_s26 = sshll.u32 (!%p167_p6), %s1266_s18, 3  ;;  %v1199_v2 = vld [vmem:[%s1421_s2 + $0x10] sm:$0xff] (!%p167_p6)   ;;  %vm246_vm0 = vcmask (!%p167_p6), 130048   ;;  %v1200_v7 = vld [vmem:[%s1421_s2 + $0x8] sm:$0xff] (!%p167_p6)   ;;  %vm356_vm1 = vcmask (!%p167_p6), 257024  }
   0xb   : > { %170 = sbr.rel (%p167_p6) target bundleno = 491 (0x1eb), region = 32  ;;  %p197_p7 = scmp.lt.s32.totalorder (!%p167_p6), %s975_s26, 15  ;;  %1122 = vmatprep.subr.bf16.mxu0 (!%p167_p6), %v1193_v0  ;;  %v1198_v1 = vld [vmem:[%s1421_s2] sm:$0xff] (!%p167_p6)   ;;  %v1201_v8 = vld [vmem:[%s1421_s2 + $0x18] sm:$0xff] (!%p167_p6)   ;;  %vm381_vm2 = vcmask (!%p167_p6), 261120   ;;  %v1203_v20 = vld [vmem:[%s1421_s2 + $0x28] sm:$0xff] (!%p167_p6)  }
   0xc   : > { %1123 = vmatpush3.bf16.msra.mxu0 (!%p167_p6), %v1193_v0  ;;  %1132 = vmatprep.subr.bf16.mxu1 (!%p167_p6), %v1198_v1  ;;  %v1202_v9 = vld [vmem:[%s1421_s2 + $0x20] sm:$0xff] (!%p167_p6)  }
   0xd   : > { %1133 = vmatpush3.bf16.msra.mxu1 (!%p167_p6), %v1198_v1  ;;  %1144 = vmatprep.subr.bf16.mxu0 (!%p167_p6), %v1199_v2 }
   0xe   : > { %1134 = vmatprep.subr.bf16.mxu1 (!%p167_p6), %v1200_v7 }
  0x11   : > { %1135 = vmatpush3.bf16.msra.mxu1 (!%p167_p6), %v1200_v7 }
  0x12   : > { %s1429_s26 = smov (!%p197_p7, %s975_s26), 15  ;;  %1156 = vmatprep.subr.bf16.mxu1 %v1202_v9 }
  0x13   : > { %s976_s5 = sshll.u32 %s1429_s26, 2  ;;  %s193_s26 = sand.u32 1, %s1218_s15  }
  0x14   : > { %s200_s8 = scalar_lea.vmem %s1419_s0, %s976_s5  ;;  %s1307_s21 = scalar_lea.vmem %s1422_s3, %s976_s5 }
  0x15   : > { %v1194_v3 = vld [vmem:[%s200_s8] sm:$0xff]   ;;  %v1195_v4 = vld [vmem:[%s200_s8 + $0x8] sm:$0xff]   ;;  %v1196_v5 = vld [vmem:[%s200_s8 + $0x10] sm:$0xff]   ;;  %s1168_s27 = smul.u32 96, %s193_s26  ;;  %s1098_s15 = sshll.u32 (%p1278_p4), %s1266_s18, 5 }
  0x16   : > { %1124 = vmatprep.mubr.msk.bf16.mxu0 %vm246_vm0, %v1194_v3  ;;  %v1197_v6 = vld [vmem:[%s200_s8 + $0x18] sm:$0xff]   ;;  %s763_s5 = scalar_lea.vmem (%p1278_p4), %s1423_s4, %s1098_s15 }
  0x17   : > { %1125 = vmatmul.mubr.msk.bf16.vlgmr.msra.gmra.mrb[0].mxu0 %vm246_vm0, %v1195_v4  ;;  %s1341_s28 = scalar_lea.vmem [#allocation2], %s1168_s27 }
  0x18   : > { %1128 = vmatprep.mubr.msk.bf16.mxu0 %vm246_vm0, %v1196_v5  ;;  %1145 = vmatpush3.bf16.msra.mxu0 %v1199_v2 }
  0x19   : > { %1146 = vmatprep.subr.bf16.mxu0 %v1201_v8 }
  0x1c   : > { %1147 = vmatpush3.bf16.msra.mxu0 %v1201_v8 }
  0x1f   : > { %1129 = vmatmul.mubr.msk.bf16.gmra.mrb[4].mxu0 %vm246_vm0, %v1197_v6 }
  0xea   : > { %v1126_v10 = vpop.f32.mrb[0].mxu0 }
  0xeb   : > { %v1068_v11 = vpack.c.bf16 %v1126_v10, %v1126_v10  ;;  %v293_v12 = vpop.f32.mrb[1].mxu0 }
  0xec   : > { %v1066_v13 = vpack.c.bf16 %v293_v12, %v293_v12  ;;  %v1127_v14 = vpop.f32.mrb[2].mxu0 }
  0xed   : > { %359 = vst.msk [vmem:[%s1307_s21 + $0x8] sm:$0xf] %vm356_vm1, %v1068_v11  ;;  %v325_v15 = vpack.c.bf16 %v1127_v14, %v1126_v10  ;;  %v1069_v16 = vpack.c.bf16 %v1127_v14, %v1127_v14  ;;  %v296_v17 = vpop.f32.mrb[3].mxu0 }
  0xee   : > { %357 = vst.msk [vmem:[%s1307_s21] sm:$0xf] %vm356_vm1, %v1066_v13  ;;  %v324_v18 = vpack.c.bf16 %v296_v17, %v293_v12  ;;  %v1067_v19 = vpack.c.bf16 %v296_v17, %v296_v17 }
  0xef   : > { %360 = vst.msk [vmem:[%s1307_s21 + $0xc] sm:$0xf] %vm356_vm1, %v1069_v16 }
  0xf0   : > { %358 = vst.msk [vmem:[%s1307_s21 + $0x4] sm:$0xf] %vm356_vm1, %v1067_v19  ;;  %1136 = vmatprep.mubr.msk.bf16.mxu1 %vm381_vm2, %v324_v18  ;;  %1148 = vmatprep.mubr.msk.bf16.mxu0 %vm381_vm2, %v324_v18 }
  0xf1   : > { %1137 = vmatmul.mubr.msk.bf16.vlgmr.msra.gmra.mrb[0].mxu1 %vm381_vm2, %v325_v15  ;;  %1149 = vmatmul.mubr.msk.bf16.vlgmr.msra.gmra.mrb[8].mxu0 %vm381_vm2, %v325_v15 }
  0xf2   : > { %1157 = vmatpush3.bf16.msra.mxu1 %v1202_v9  ;;  %v1130_v21 = vpop.f32.mrb[4].mxu0 }
  0xf3   : > { %v1072_v22 = vpack.c.bf16 %v1130_v21, %v1130_v21  ;;  %v309_v23 = vpop.f32.mrb[5].mxu0  ;;  %1158 = vmatprep.subr.bf16.mxu1 %v1203_v20 }
  0xf4   : > { %v1070_v24 = vpack.c.bf16 %v309_v23, %v309_v23  ;;  %v1131_v25 = vpop.f32.mrb[6].mxu0 }
  0xf5   : > { %363 = vst.msk [vmem:[%s1307_s21 + $0x18] sm:$0xf] %vm356_vm1, %v1072_v22  ;;  %v327_v26 = vpack.c.bf16 %v1131_v25, %v1130_v21  ;;  %v1073_v27 = vpack.c.bf16 %v1131_v25, %v1131_v25  ;;  %v312_v28 = vpop.f32.mrb[7].mxu0 }
  0xf6   : > { %361 = vst.msk [vmem:[%s1307_s21 + $0x10] sm:$0xf] %vm356_vm1, %v1070_v24  ;;  %v326_v29 = vpack.c.bf16 %v312_v28, %v309_v23  ;;  %v1071_v30 = vpack.c.bf16 %v312_v28, %v312_v28  ;;  %1159 = vmatpush3.bf16.msra.mxu1 %v1203_v20 }
  0xf7   : > { %364 = vst.msk [vmem:[%s1307_s21 + $0x1c] sm:$0xf] %vm356_vm1, %v1073_v27 }
  0xf8   : > { %362 = vst.msk [vmem:[%s1307_s21 + $0x14] sm:$0xf] %vm356_vm1, %v1071_v30  ;;  %1140 = vmatprep.mubr.msk.bf16.mxu1 %vm381_vm2, %v326_v29  ;;  %1152 = vmatprep.mubr.msk.bf16.mxu0 %vm381_vm2, %v326_v29 }
  0xf9   : > { %1141 = vmatmul.mubr.msk.bf16.gmra.mrb[4].mxu1 %vm381_vm2, %v327_v26  ;;  %1153 = vmatmul.mubr.msk.bf16.gmra.mrb[12].mxu0 %vm381_vm2, %v327_v26 }
  0xfa   : > { %1160 = vmatprep.mubr.msk.bf16.mxu1 %vm381_vm2, %v324_v18 }
 0x101   : > { %1161 = vmatmul.mubr.msk.bf16.vlgmr.msra.gmra.mrb[8].mxu1 %vm381_vm2, %v325_v15 }
 0x102   : > { %1164 = vmatprep.mubr.msk.bf16.mxu1 %vm381_vm2, %v326_v29 }
 0x109   : > { %1165 = vmatmul.mubr.msk.bf16.gmra.mrb[12].mxu1 %vm381_vm2, %v327_v26 }
 0x1c4   : > { %v1138_v31 = vpop.f32.mrb[0].mxu1  ;;  %v1150_v32 = vpop.f32.mrb[8].mxu0 }
 0x1c5   : > { %v1076_v33 = vpack.c.bf16 %v1138_v31, %v1138_v31  ;;  %v1084_v34 = vpack.c.bf16 %v1150_v32, %v1150_v32  ;;  %v428_v35 = vpop.f32.mrb[1].mxu1  ;;  %v550_v36 = vpop.f32.mrb[9].mxu0 }
 0x1c6   : > { %v1074_v37 = vpack.c.bf16 %v428_v35, %v428_v35  ;;  %v1082_v38 = vpack.c.bf16 %v550_v36, %v550_v36  ;;  %v1139_v39 = vpop.f32.mrb[2].mxu1  ;;  %v1151_v40 = vpop.f32.mrb[10].mxu0 }
 0x1c7   : > { %493 = vst.msk [vmem:[%s1341_s28 + $0x8] sm:$0xf] %vm356_vm1, %v1076_v33  ;;  %1030 = vst.msk [vmem:[%s1341_s28 + $0x28] sm:$0xf] %vm356_vm1, %v1084_v34  ;;  %v1077_v41 = vpack.c.bf16 %v1139_v39, %v1139_v39  ;;  %v1085_v42 = vpack.c.bf16 %v1151_v40, %v1151_v40  ;;  %v431_v43 = vpop.f32.mrb[3].mxu1  ;;  %v553_v44 = vpop.f32.mrb[11].mxu0 }
 0x1c8   : > { %491 = vst.msk [vmem:[%s1341_s28] sm:$0xf] %vm356_vm1, %v1074_v37  ;;  %1028 = vst.msk [vmem:[%s1341_s28 + $0x20] sm:$0xf] %vm356_vm1, %v1082_v38  ;;  %v1075_v45 = vpack.c.bf16 %v431_v43, %v431_v43  ;;  %v1083_v46 = vpack.c.bf16 %v553_v44, %v553_v44 }
 0x1c9   : > { %494 = vst.msk [vmem:[%s1341_s28 + $0xc] sm:$0xf] %vm356_vm1, %v1077_v41  ;;  %1031 = vst.msk [vmem:[%s1341_s28 + $0x2c] sm:$0xf] %vm356_vm1, %v1085_v42 }
 0x1ca   : > { %492 = vst.msk [vmem:[%s1341_s28 + $0x4] sm:$0xf] %vm356_vm1, %v1075_v45  ;;  %1029 = vst.msk [vmem:[%s1341_s28 + $0x24] sm:$0xf] %vm356_vm1, %v1083_v46 }
 0x1cc   : > { %v1142_v47 = vpop.f32.mrb[4].mxu1  ;;  %v1154_v48 = vpop.f32.mrb[12].mxu0 }
 0x1cd   : > { %v1080_v49 = vpack.c.bf16 %v1142_v47, %v1142_v47  ;;  %v1088_v50 = vpack.c.bf16 %v1154_v48, %v1154_v48  ;;  %v444_v51 = vpop.f32.mrb[5].mxu1  ;;  %v566_v52 = vpop.f32.mrb[13].mxu0 }
 0x1ce   : > { %v1078_v53 = vpack.c.bf16 %v444_v51, %v444_v51  ;;  %v1086_v54 = vpack.c.bf16 %v566_v52, %v566_v52  ;;  %v1143_v55 = vpop.f32.mrb[6].mxu1  ;;  %v1155_v56 = vpop.f32.mrb[14].mxu0 }
 0x1cf   : > { %497 = vst.msk [vmem:[%s1341_s28 + $0x18] sm:$0xf] %vm356_vm1, %v1080_v49  ;;  %1034 = vst.msk [vmem:[%s1341_s28 + $0x38] sm:$0xf] %vm356_vm1, %v1088_v50  ;;  %v1081_v57 = vpack.c.bf16 %v1143_v55, %v1143_v55  ;;  %v1089_v58 = vpack.c.bf16 %v1155_v56, %v1155_v56  ;;  %v447_v59 = vpop.f32.mrb[7].mxu1  ;;  %v569_v60 = vpop.f32.mrb[15].mxu0 }
 0x1d0   : > { %495 = vst.msk [vmem:[%s1341_s28 + $0x10] sm:$0xf] %vm356_vm1, %v1078_v53  ;;  %1032 = vst.msk [vmem:[%s1341_s28 + $0x30] sm:$0xf] %vm356_vm1, %v1086_v54  ;;  %v1079_v61 = vpack.c.bf16 %v447_v59, %v447_v59  ;;  %v1087_v62 = vpack.c.bf16 %v569_v60, %v569_v60  ;;  %v783_v16 = vld [vmem:[%s1341_s28 + $0x8] sm:$0xff] (%p1278_p4)  }
 0x1d1   : > { %498 = vst.msk [vmem:[%s1341_s28 + $0x1c] sm:$0xf] %vm356_vm1, %v1081_v57  ;;  %1035 = vst.msk [vmem:[%s1341_s28 + $0x3c] sm:$0xf] %vm356_vm1, %v1089_v58  ;;  %v779_v15 = vld [vmem:[%s1341_s28] sm:$0xff] (%p1278_p4)   ;;  %v799_v20 = vld [vmem:[%s1341_s28 + $0x28] sm:$0xff] (%p1278_p4)  }
 0x1d2   : > { %496 = vst.msk [vmem:[%s1341_s28 + $0x14] sm:$0xf] %vm356_vm1, %v1079_v61  ;;  %1033 = vst.msk [vmem:[%s1341_s28 + $0x34] sm:$0xf] %vm356_vm1, %v1087_v62  ;;  %v795_v19 = vld [vmem:[%s1341_s28 + $0x20] sm:$0xff] (%p1278_p4)  }
 0x1d3   : > { %780 = vst [vmem:[%s763_s5] sm:$0xff] (%p1278_p4), %v779_v15   ;;  %784 = vst [vmem:[%s763_s5 + $0x8] sm:$0xff] (%p1278_p4), %v783_v16  }
 0x1d4   : > { %v1162_v63 = vpop.f32.mrb[8].mxu1  ;;  %796 = vst [vmem:[%s763_s5 + $0x40] sm:$0xff] (%p1278_p4), %v795_v19   ;;  %800 = vst [vmem:[%s763_s5 + $0x48] sm:$0xff] (%p1278_p4), %v799_v20  }
 0x1d5   : > { %v1092_v0 = vpack.c.bf16 %v1162_v63, %v1162_v63  ;;  %v673_v1 = vpop.f32.mrb[9].mxu1 }
 0x1d6   : > { %v1090_v2 = vpack.c.bf16 %v673_v1, %v673_v1  ;;  %v1163_v3 = vpop.f32.mrb[10].mxu1 }
 0x1d7   : > { %1056 = vst.msk [vmem:[%s1341_s28 + $0x48] sm:$0xf] %vm356_vm1, %v1092_v0  ;;  %v1093_v4 = vpack.c.bf16 %v1163_v3, %v1163_v3  ;;  %v676_v5 = vpop.f32.mrb[11].mxu1 }
 0x1d8   : > { %1054 = vst.msk [vmem:[%s1341_s28 + $0x40] sm:$0xf] %vm356_vm1, %v1090_v2  ;;  %v1091_v6 = vpack.c.bf16 %v676_v5, %v676_v5  ;;  %v791_v18 = vld [vmem:[%s1341_s28 + $0x18] sm:$0xff] (%p1278_p4)  }
 0x1d9   : > { %1057 = vst.msk [vmem:[%s1341_s28 + $0x4c] sm:$0xf] %vm356_vm1, %v1093_v4  ;;  %v787_v17 = vld [vmem:[%s1341_s28 + $0x10] sm:$0xff] (%p1278_p4)   ;;  %792 = vst [vmem:[%s763_s5 + $0x18] sm:$0xff] (%p1278_p4), %v791_v18   ;;  %v807_v22 = vld [vmem:[%s1341_s28 + $0x38] sm:$0xff] (%p1278_p4)  }
 0x1da   : > { %1055 = vst.msk [vmem:[%s1341_s28 + $0x44] sm:$0xf] %vm356_vm1, %v1091_v6  ;;  %788 = vst [vmem:[%s763_s5 + $0x10] sm:$0xff] (%p1278_p4), %v787_v17   ;;  %v803_v21 = vld [vmem:[%s1341_s28 + $0x30] sm:$0xff] (%p1278_p4)  }
 0x1db   : > { %804 = vst [vmem:[%s763_s5 + $0x50] sm:$0xff] (%p1278_p4), %v803_v21   ;;  %808 = vst [vmem:[%s763_s5 + $0x58] sm:$0xff] (%p1278_p4), %v807_v22  }
 0x1dc   : > { %v1166_v7 = vpop.f32.mrb[12].mxu1  ;;  %760 = sbr.rel (!%p1278_p4) target bundleno = 491 (0x1eb), region = 40 }
 0x1dd   : > { %v1096_v8 = vpack.c.bf16 %v1166_v7, %v1166_v7  ;;  %v689_v9 = vpop.f32.mrb[13].mxu1 }
 0x1de   : > { %v1094_v10 = vpack.c.bf16 %v689_v9, %v689_v9  ;;  %v1167_v11 = vpop.f32.mrb[14].mxu1 }
 0x1df   : > { %1060 = vst.msk [vmem:[%s1341_s28 + $0x58] sm:$0xf] %vm356_vm1, %v1096_v8  ;;  %v1097_v12 = vpack.c.bf16 %v1167_v11, %v1167_v11  ;;  %v692_v13 = vpop.f32.mrb[15].mxu1 }
 0x1e0   : > { %1058 = vst.msk [vmem:[%s1341_s28 + $0x50] sm:$0xf] %vm356_vm1, %v1094_v10  ;;  %v1095_v14 = vpack.c.bf16 %v692_v13, %v692_v13  ;;  %v815_v24 = vld [vmem:[%s1341_s28 + $0x48] sm:$0xff] (%p1278_p4)  }
 0x1e1   : > { %1061 = vst.msk [vmem:[%s1341_s28 + $0x5c] sm:$0xf] %vm356_vm1, %v1097_v12  ;;  %v811_v23 = vld [vmem:[%s1341_s28 + $0x40] sm:$0xff] (%p1278_p4)   ;;  %816 = vst [vmem:[%s763_s5 + $0x88] sm:$0xff] (%p1278_p4), %v815_v24  }
 0x1e2   : > { %1059 = vst.msk [vmem:[%s1341_s28 + $0x54] sm:$0xf] %vm356_vm1, %v1095_v14  ;;  %812 = vst [vmem:[%s763_s5 + $0x80] sm:$0xff] (%p1278_p4), %v811_v23  }
 0x1e8   : > { %v823_v26 = vld [vmem:[%s1341_s28 + $0x58] sm:$0xff]  }
 0x1e9   : > { %v819_v25 = vld [vmem:[%s1341_s28 + $0x50] sm:$0xff]   ;;  %824 = vst [vmem:[%s763_s5 + $0x98] sm:$0xff] %v823_v26  }
 0x1ea   : > { %820 = vst [vmem:[%s763_s5 + $0x90] sm:$0xff] %v819_v25  }
 0x1eb PF: > { %p12_p8 = scmp.ge.s32.totalorder %s1268_s19, 4   ;;  %s1425_s15 = smov %s1222_s16 }
 0x1ec   : > { %s1426_s16 = smov %s1276_s22  ;;  %s1427_s17 = smov %s1268_s19 }
 0x1ed   :  { %14 = sbr.rel (!%p12_p8) target bundleno = 2 (0x2), region = 119 }

</bundles_post_ra>
